<compile_context>
chip_gen: v7x
topology: tpu7x:2x2x1
jax: 0.10.0
libtpu: 0.0.40
codegen_flags: <defaults>
</compile_context>

<pallas_src>
import jax
import jax.numpy as jnp
from jax import lax
from jax.experimental import pallas as pl
from jax.experimental.pallas import tpu as pltpu


def _layer_norm(x, gamma, beta, eps=1e-5):
    """LayerNorm over the last dim, f32 math (matches nn.LayerNorm, eps=1e-5)."""
    mu = jnp.mean(x, axis=-1, keepdims=True)
    xc = x - mu
    var = jnp.mean(xc * xc, axis=-1, keepdims=True)
    return xc * lax.rsqrt(var + eps) * gamma + beta


def variance_predictor_kernel(xs_ref,                      # (1, T, 3H) bf16  (pre-stacked taps)
                              w1_ref, b1_ref, g1_ref, be1_ref,
                              w2_ref, b2_ref, g2_ref, be2_ref,
                              wl_ref, bl_ref,
                              out_ref):                    # (1, 1, T) f32
    xs = xs_ref[0]                                         # (T, 3H) bf16
    T = xs.shape[0]

    # ---- conv1: single fused wide-K (K = 3H) bf16 matmul, f32 accumulate ----
    y1 = jnp.dot(xs, w1_ref[...], preferred_element_type=jnp.float32)   # (T, F) f32
    y1 = jnp.maximum(y1 + b1_ref[...], 0.0)                              # bias + ReLU
    h1 = _layer_norm(y1, g1_ref[...], be1_ref[...])                      # (T, F) f32
    # dropout1: identity (eval mode)

    # ---- conv2: input-side shifts (zero halo) + 3 bf16 MXU dots (K = F) ----
    rows = lax.broadcasted_iota(jnp.int32, (T, 1), 0)      # cheap (T,1) edge mask
    prev = jnp.where(rows == 0, 0.0, pltpu.roll(h1, shift=1, axis=0))        # h1[t-1]
    nxt = jnp.where(rows == T - 1, 0.0, pltpu.roll(h1, shift=T - 1, axis=0))  # h1[t+1]
    y2 = (jnp.dot(prev.astype(jnp.bfloat16), w2_ref[0],
                  preferred_element_type=jnp.float32)
          + jnp.dot(h1.astype(jnp.bfloat16), w2_ref[1],
                    preferred_element_type=jnp.float32)
          + jnp.dot(nxt.astype(jnp.bfloat16), w2_ref[2],
                    preferred_element_type=jnp.float32))                  # (T, F) f32
    y2 = jnp.maximum(y2 + b2_ref[...], 0.0)
    h2 = _layer_norm(y2, g2_ref[...], be2_ref[...])                       # (T, F) f32
    # dropout2: identity (eval mode)

    # ---- final linear (F -> 1), lane-dense: (1,F) . (T,F)^T -> (1,T) ----
    out = lax.dot_general(wl_ref[...], h2.astype(jnp.bfloat16),
                          dimension_numbers=(((1,), (1,)), ((), ())),
                          preferred_element_type=jnp.float32)             # (1, T)
    out_ref[0] = (out + bl_ref[...]).astype(out_ref.dtype)


def variance_predictor(x, mask, params):
    """x: (B, T, H) float32;  mask: (B, 1, T) (1 = keep, 0 = pad).  Returns (B, T)."""
    B, T, H = x.shape
    Fo = params["w1"].shape[-1]

    # --- wrapper-side prep: bf16 operands + fused conv1 taps ---
    xb = x.astype(jnp.bfloat16)
    x_prev = jnp.pad(xb, ((0, 0), (1, 0), (0, 0)))[:, :T]   # x[t-1], zero at t=0
    x_next = jnp.pad(xb, ((0, 0), (0, 1), (0, 0)))[:, 1:]   # x[t+1], zero at t=T-1
    x_stacked = jnp.concatenate([x_prev, xb, x_next], axis=-1)          # (B, T, 3H)

    w1f = params["w1"].reshape(3 * H, Fo).astype(jnp.bfloat16)          # (3H, F)
    w2b = params["w2"].astype(jnp.bfloat16)                             # (3, F, F)
    wlb = params["wl"].reshape(1, Fo).astype(jnp.bfloat16)              # (1, F)

    out = pl.pallas_call(
        variance_predictor_kernel,
        out_shape=jax.ShapeDtypeStruct((B, 1, T), jnp.float32),
        grid_spec=pltpu.PrefetchScalarGridSpec(
            num_scalar_prefetch=0,
            grid=(B,),
            in_specs=[
                pl.BlockSpec((1, T, 3 * H), lambda b: (b, 0, 0)),  # stacked x taps
                pl.BlockSpec((3 * H, Fo), lambda b: (0, 0)),       # conv1 fused weight
                pl.BlockSpec((1, Fo), lambda b: (0, 0)),           # conv1 bias
                pl.BlockSpec((1, Fo), lambda b: (0, 0)),           # ln1 gamma
                pl.BlockSpec((1, Fo), lambda b: (0, 0)),           # ln1 beta
                pl.BlockSpec((3, Fo, Fo), lambda b: (0, 0, 0)),    # conv2 weight
                pl.BlockSpec((1, Fo), lambda b: (0, 0)),           # conv2 bias
                pl.BlockSpec((1, Fo), lambda b: (0, 0)),           # ln2 gamma
                pl.BlockSpec((1, Fo), lambda b: (0, 0)),           # ln2 beta
                pl.BlockSpec((1, Fo), lambda b: (0, 0)),           # linear weight
                pl.BlockSpec((1, 1), lambda b: (0, 0)),            # linear bias
            ],
            out_specs=pl.BlockSpec((1, 1, T), lambda b: (b, 0, 0)),
        ),
        compiler_params=pltpu.CompilerParams(
            dimension_semantics=("parallel",),      # megacore-shard B on v7x
            vmem_limit_bytes=32 * 1024 * 1024,      # safe on v5e/v6e/v7x; lifts v5e's 16 MiB default
        ),
    )(x_stacked, w1f, params["b1"], params["g1"], params["be1"],
      w2b, params["b2"], params["g2"], params["be2"],
      wlb, params["bl"])

    out2d = out[:, 0, :]                                               # (B, T)
    # masked_fill(mask == 0, 0.0) done in XLA (trivial elementwise fusion).
    return jnp.where(mask[:, 0, :] == 0, 0.0, out2d)


def init_params(key, H, Fo):
    ks = jax.random.split(key, 8)
    s1 = 1.0 / jnp.sqrt(jnp.float32(3 * H))
    s2 = 1.0 / jnp.sqrt(jnp.float32(3 * Fo))
    sl = 1.0 / jnp.sqrt(jnp.float32(Fo))
    return {
        "w1": jax.random.normal(ks[0], (3, H, Fo), jnp.float32) * s1,
        "b1": jax.random.normal(ks[1], (1, Fo), jnp.float32) * 0.1,
        "g1": 1.0 + 0.1 * jax.random.normal(ks[2], (1, Fo), jnp.float32),
        "be1": 0.1 * jax.random.normal(ks[3], (1, Fo), jnp.float32),
        "w2": jax.random.normal(ks[4], (3, Fo, Fo), jnp.float32) * s2,
        "b2": jax.random.normal(ks[5], (1, Fo), jnp.float32) * 0.1,
        "g2": 1.0 + 0.1 * jax.random.normal(ks[6], (1, Fo), jnp.float32),
        "be2": 0.1 * jax.random.normal(ks[7], (1, Fo), jnp.float32),
        "wl": jax.random.normal(jax.random.fold_in(key, 99), (Fo, 1), jnp.float32) * sl,
        "bl": jnp.full((1, 1), 0.05, jnp.float32),
    }


def reference(x, mask, p):
    """Pure-JAX reference of the PyTorch forward (eval mode), using the same
    bf16-operand / f32-accumulate matmul regime as the kernel."""
    bf = jnp.bfloat16
    f32 = jnp.float32

    def conv(xx, w, b):
        xb = xx.astype(bf)
        wb = w.astype(bf)
        xp = jnp.pad(xb, ((0, 0), (1, 1), (0, 0)))
        y = (jnp.einsum("btc,cf->btf", xp[:, :-2], wb[0], preferred_element_type=f32)
             + jnp.einsum("btc,cf->btf", xp[:, 1:-1], wb[1], preferred_element_type=f32)
             + jnp.einsum("btc,cf->btf", xp[:, 2:], wb[2], preferred_element_type=f32))
        return y + b

    def ln(xx, g, bta):
        mu = xx.mean(-1, keepdims=True)
        var = ((xx - mu) ** 2).mean(-1, keepdims=True)
        return (xx - mu) / jnp.sqrt(var + 1e-5) * g + bta

    h = ln(jnp.maximum(conv(x, p["w1"], p["b1"]), 0.0), p["g1"], p["be1"])
    h = ln(jnp.maximum(conv(h, p["w2"], p["b2"]), 0.0), p["g2"], p["be2"])
    out = jnp.einsum("btf,fo->bto", h.astype(bf), p["wl"].astype(bf),
                     preferred_element_type=f32)[..., 0] + p["bl"][0, 0]
    return jnp.where(mask[:, 0, :] == 0, 0.0, out)


if __name__ == "__main__":
    B, T, H, Fo = 2, 8, 32, 64   # batch, seq, encoder_hidden, filter_size (small)

    key = jax.random.PRNGKey(0)
    kx, kp = jax.random.split(key)
    x = jax.random.normal(kx, (B, T, H), jnp.float32)

    lengths = jnp.array([T, 5], jnp.int32)
    mask = (jnp.arange(T)[None, None, :] < lengths[:, None, None]).astype(jnp.float32)  # (B,1,T)

    params = init_params(kp, H, Fo)

    out = jax.block_until_ready(variance_predictor(x, mask, params))
    ref = jax.block_until_ready(reference(x, mask, params))

    assert out.shape == (B, T)
    assert jnp.allclose(out, ref, atol=2e-3, rtol=2e-3), (out, ref)

    print("KERNEL_OK")
</pallas_src>

<mosaic_0001>
module attributes {stable_mosaic.version = 11 : i64} {
  func.func @variance_predictor_kernel(%arg0: i32, %arg1: memref<1x8x96xbf16, #tpu.memory_space<vmem>>, %arg2: memref<96x64xbf16, #tpu.memory_space<vmem>>, %arg3: memref<1x64xf32, #tpu.memory_space<vmem>>, %arg4: memref<1x64xf32, #tpu.memory_space<vmem>>, %arg5: memref<1x64xf32, #tpu.memory_space<vmem>>, %arg6: memref<3x64x64xbf16, #tpu.memory_space<vmem>>, %arg7: memref<1x64xf32, #tpu.memory_space<vmem>>, %arg8: memref<1x64xf32, #tpu.memory_space<vmem>>, %arg9: memref<1x64xf32, #tpu.memory_space<vmem>>, %arg10: memref<1x64xbf16, #tpu.memory_space<vmem>>, %arg11: memref<1x1xf32, #tpu.memory_space<vmem>>, %arg12: memref<1x1x8xf32, #tpu.memory_space<vmem>>) attributes {dimension_semantics = [#tpu.dimension_semantics<parallel>], iteration_bounds = array<i64: 2>, scalar_prefetch = 0 : i64, scratch_operands = 0 : i64, tpu.core_type = #tpu.core_type<tc>, window_params = [{transform_indices = @transform_0, window_bounds = array<i64: 1, 8, 96>}, {pipeline_mode = #tpu.pipeline_mode<synchronous>, transform_indices = @transform_1, window_bounds = array<i64: 96, 64>}, {pipeline_mode = #tpu.pipeline_mode<synchronous>, transform_indices = @transform_2, window_bounds = array<i64: 1, 64>}, {pipeline_mode = #tpu.pipeline_mode<synchronous>, transform_indices = @transform_3, window_bounds = array<i64: 1, 64>}, {pipeline_mode = #tpu.pipeline_mode<synchronous>, transform_indices = @transform_4, window_bounds = array<i64: 1, 64>}, {pipeline_mode = #tpu.pipeline_mode<synchronous>, transform_indices = @transform_5, window_bounds = array<i64: 3, 64, 64>}, {pipeline_mode = #tpu.pipeline_mode<synchronous>, transform_indices = @transform_6, window_bounds = array<i64: 1, 64>}, {pipeline_mode = #tpu.pipeline_mode<synchronous>, transform_indices = @transform_7, window_bounds = array<i64: 1, 64>}, {pipeline_mode = #tpu.pipeline_mode<synchronous>, transform_indices = @transform_8, window_bounds = array<i64: 1, 64>}, {pipeline_mode = #tpu.pipeline_mode<synchronous>, transform_indices = @transform_9, window_bounds = array<i64: 1, 64>}, {pipeline_mode = #tpu.pipeline_mode<synchronous>, transform_indices = @transform_10, window_bounds = array<i64: 1, 1>}, {transform_indices = @transform_11, window_bounds = array<i64: 1, 1, 8>}]} {
    %c0 = arith.constant 0 : index
    %c0_0 = arith.constant 0 : index
    %c0_1 = arith.constant 0 : index
    %0 = vector.load %arg1[%c0, %c0_0, %c0_1] : memref<1x8x96xbf16, #tpu.memory_space<vmem>>, vector<1x8x96xbf16>
    %1 = vector.shape_cast %0 : vector<1x8x96xbf16> to vector<8x96xbf16>
    %c0_2 = arith.constant 0 : index
    %c0_3 = arith.constant 0 : index
    %2 = vector.load %arg2[%c0_2, %c0_3] : memref<96x64xbf16, #tpu.memory_space<vmem>>, vector<96x64xbf16>
    %cst = arith.constant dense<0.000000e+00> : vector<8x64xf32>
    %3 = tpu.matmul %1, %2, %cst {dimension_numbers = #tpu.dot_dimension_numbers<[1], [0], [0], [1], [0, 0, 1, 1], [], []>} : vector<8x96xbf16>, vector<96x64xbf16>, vector<8x64xf32> -> vector<8x64xf32>
    %c0_4 = arith.constant 0 : index
    %c0_5 = arith.constant 0 : index
    %4 = vector.load %arg3[%c0_4, %c0_5] : memref<1x64xf32, #tpu.memory_space<vmem>>, vector<1x64xf32>
    %5 = vector.broadcast %4 : vector<1x64xf32> to vector<8x64xf32>
    %6 = arith.addf %3, %5 : vector<8x64xf32>
    %cst_6 = arith.constant 0.000000e+00 : f32
    %7 = vector.broadcast %cst_6 : f32 to vector<8x64xf32>
    %8 = arith.maximumf %6, %7 : vector<8x64xf32>
    %c0_7 = arith.constant 0 : index
    %c0_8 = arith.constant 0 : index
    %9 = vector.load %arg4[%c0_7, %c0_8] : memref<1x64xf32, #tpu.memory_space<vmem>>, vector<1x64xf32>
    %c0_9 = arith.constant 0 : index
    %c0_10 = arith.constant 0 : index
    %10 = vector.load %arg5[%c0_9, %c0_10] : memref<1x64xf32, #tpu.memory_space<vmem>>, vector<1x64xf32>
    %cst_11 = arith.constant dense<0.000000e+00> : vector<8xf32>
    %11 = vector.multi_reduction <add>, %8, %cst_11 [1] : vector<8x64xf32> to vector<8xf32>
    %12 = vector.shape_cast %11 : vector<8xf32> to vector<8x1xf32>
    %cst_12 = arith.constant 6.400000e+01 : f32
    %13 = vector.broadcast %cst_12 : f32 to vector<8x1xf32>
    %14 = arith.divf %12, %13 : vector<8x1xf32>
    %15 = vector.broadcast %14 : vector<8x1xf32> to vector<8x64xf32>
    %16 = arith.subf %8, %15 : vector<8x64xf32>
    %17 = arith.mulf %16, %16 : vector<8x64xf32>
    %cst_13 = arith.constant dense<0.000000e+00> : vector<8xf32>
    %18 = vector.multi_reduction <add>, %17, %cst_13 [1] : vector<8x64xf32> to vector<8xf32>
    %19 = vector.shape_cast %18 : vector<8xf32> to vector<8x1xf32>
    %cst_14 = arith.constant 6.400000e+01 : f32
    %20 = vector.broadcast %cst_14 : f32 to vector<8x1xf32>
    %21 = arith.divf %19, %20 : vector<8x1xf32>
    %cst_15 = arith.constant 9.99999974E-6 : f32
    %22 = vector.broadcast %cst_15 : f32 to vector<8x1xf32>
    %23 = arith.addf %21, %22 : vector<8x1xf32>
    %24 = math.rsqrt %23 : vector<8x1xf32>
    %25 = vector.broadcast %24 : vector<8x1xf32> to vector<8x64xf32>
    %26 = arith.mulf %16, %25 : vector<8x64xf32>
    %27 = vector.broadcast %9 : vector<1x64xf32> to vector<8x64xf32>
    %28 = arith.mulf %26, %27 : vector<8x64xf32>
    %29 = vector.broadcast %10 : vector<1x64xf32> to vector<8x64xf32>
    %30 = arith.addf %28, %29 : vector<8x64xf32>
    %31 = tpu.iota {dimensions = array<i32: 0>} : vector<8x1xi32>
    %c0_i32 = arith.constant 0 : i32
    %32 = vector.broadcast %c0_i32 : i32 to vector<8x1xi32>
    %33 = arith.cmpi eq, %31, %32 : vector<8x1xi32>
    %c1_i32 = arith.constant 1 : i32
    %34 = tpu.dynamic_rotate %30 by %c1_i32 dim 0 : vector<8x64xf32>, i32 -> vector<8x64xf32>
    %cst_16 = arith.constant 0.000000e+00 : f32
    %35 = vector.shape_cast %33 : vector<8x1xi1> to vector<8x1xi1>
    %36 = vector.broadcast %35 : vector<8x1xi1> to vector<8x64xi1>
    %37 = vector.broadcast %cst_16 : f32 to vector<8x64xf32>
    %38 = arith.select %36, %37, %34 : vector<8x64xi1>, vector<8x64xf32>
    %c7_i32 = arith.constant 7 : i32
    %39 = vector.broadcast %c7_i32 : i32 to vector<8x1xi32>
    %40 = arith.cmpi eq, %31, %39 : vector<8x1xi32>
    %c7_i32_17 = arith.constant 7 : i32
    %41 = tpu.dynamic_rotate %30 by %c7_i32_17 dim 0 : vector<8x64xf32>, i32 -> vector<8x64xf32>
    %cst_18 = arith.constant 0.000000e+00 : f32
    %42 = vector.shape_cast %40 : vector<8x1xi1> to vector<8x1xi1>
    %43 = vector.broadcast %42 : vector<8x1xi1> to vector<8x64xi1>
    %44 = vector.broadcast %cst_18 : f32 to vector<8x64xf32>
    %45 = arith.select %43, %44, %41 : vector<8x64xi1>, vector<8x64xf32>
    %46 = arith.truncf %38 : vector<8x64xf32> to vector<8x64xbf16>
    %c0_19 = arith.constant 0 : index
    %c0_20 = arith.constant 0 : index
    %c0_21 = arith.constant 0 : index
    %47 = vector.load %arg6[%c0_19, %c0_20, %c0_21] : memref<3x64x64xbf16, #tpu.memory_space<vmem>>, vector<1x64x64xbf16>
    %48 = vector.shape_cast %47 : vector<1x64x64xbf16> to vector<64x64xbf16>
    %cst_22 = arith.constant dense<0.000000e+00> : vector<8x64xf32>
    %49 = tpu.matmul %46, %48, %cst_22 {dimension_numbers = #tpu.dot_dimension_numbers<[1], [0], [0], [1], [0, 0, 1, 1], [], []>} : vector<8x64xbf16>, vector<64x64xbf16>, vector<8x64xf32> -> vector<8x64xf32>
    %50 = arith.truncf %30 : vector<8x64xf32> to vector<8x64xbf16>
    %c1 = arith.constant 1 : index
    %c0_23 = arith.constant 0 : index
    %c0_24 = arith.constant 0 : index
    %51 = vector.load %arg6[%c1, %c0_23, %c0_24] : memref<3x64x64xbf16, #tpu.memory_space<vmem>>, vector<1x64x64xbf16>
    %52 = vector.shape_cast %51 : vector<1x64x64xbf16> to vector<64x64xbf16>
    %cst_25 = arith.constant dense<0.000000e+00> : vector<8x64xf32>
    %53 = tpu.matmul %50, %52, %cst_25 {dimension_numbers = #tpu.dot_dimension_numbers<[1], [0], [0], [1], [0, 0, 1, 1], [], []>} : vector<8x64xbf16>, vector<64x64xbf16>, vector<8x64xf32> -> vector<8x64xf32>
    %54 = arith.addf %49, %53 : vector<8x64xf32>
    %55 = arith.truncf %45 : vector<8x64xf32> to vector<8x64xbf16>
    %c2 = arith.constant 2 : index
    %c0_26 = arith.constant 0 : index
    %c0_27 = arith.constant 0 : index
    %56 = vector.load %arg6[%c2, %c0_26, %c0_27] : memref<3x64x64xbf16, #tpu.memory_space<vmem>>, vector<1x64x64xbf16>
    %57 = vector.shape_cast %56 : vector<1x64x64xbf16> to vector<64x64xbf16>
    %cst_28 = arith.constant dense<0.000000e+00> : vector<8x64xf32>
    %58 = tpu.matmul %55, %57, %cst_28 {dimension_numbers = #tpu.dot_dimension_numbers<[1], [0], [0], [1], [0, 0, 1, 1], [], []>} : vector<8x64xbf16>, vector<64x64xbf16>, vector<8x64xf32> -> vector<8x64xf32>
    %59 = arith.addf %54, %58 : vector<8x64xf32>
    %c0_29 = arith.constant 0 : index
    %c0_30 = arith.constant 0 : index
    %60 = vector.load %arg7[%c0_29, %c0_30] : memref<1x64xf32, #tpu.memory_space<vmem>>, vector<1x64xf32>
    %61 = vector.broadcast %60 : vector<1x64xf32> to vector<8x64xf32>
    %62 = arith.addf %59, %61 : vector<8x64xf32>
    %cst_31 = arith.constant 0.000000e+00 : f32
    %63 = vector.broadcast %cst_31 : f32 to vector<8x64xf32>
    %64 = arith.maximumf %62, %63 : vector<8x64xf32>
    %c0_32 = arith.constant 0 : index
    %c0_33 = arith.constant 0 : index
    %65 = vector.load %arg8[%c0_32, %c0_33] : memref<1x64xf32, #tpu.memory_space<vmem>>, vector<1x64xf32>
    %c0_34 = arith.constant 0 : index
    %c0_35 = arith.constant 0 : index
    %66 = vector.load %arg9[%c0_34, %c0_35] : memref<1x64xf32, #tpu.memory_space<vmem>>, vector<1x64xf32>
    %cst_36 = arith.constant dense<0.000000e+00> : vector<8xf32>
    %67 = vector.multi_reduction <add>, %64, %cst_36 [1] : vector<8x64xf32> to vector<8xf32>
    %68 = vector.shape_cast %67 : vector<8xf32> to vector<8x1xf32>
    %cst_37 = arith.constant 6.400000e+01 : f32
    %69 = vector.broadcast %cst_37 : f32 to vector<8x1xf32>
    %70 = arith.divf %68, %69 : vector<8x1xf32>
    %71 = vector.broadcast %70 : vector<8x1xf32> to vector<8x64xf32>
    %72 = arith.subf %64, %71 : vector<8x64xf32>
    %73 = arith.mulf %72, %72 : vector<8x64xf32>
    %cst_38 = arith.constant dense<0.000000e+00> : vector<8xf32>
    %74 = vector.multi_reduction <add>, %73, %cst_38 [1] : vector<8x64xf32> to vector<8xf32>
    %75 = vector.shape_cast %74 : vector<8xf32> to vector<8x1xf32>
    %cst_39 = arith.constant 6.400000e+01 : f32
    %76 = vector.broadcast %cst_39 : f32 to vector<8x1xf32>
    %77 = arith.divf %75, %76 : vector<8x1xf32>
    %cst_40 = arith.constant 9.99999974E-6 : f32
    %78 = vector.broadcast %cst_40 : f32 to vector<8x1xf32>
    %79 = arith.addf %77, %78 : vector<8x1xf32>
    %80 = math.rsqrt %79 : vector<8x1xf32>
    %81 = vector.broadcast %80 : vector<8x1xf32> to vector<8x64xf32>
    %82 = arith.mulf %72, %81 : vector<8x64xf32>
    %83 = vector.broadcast %65 : vector<1x64xf32> to vector<8x64xf32>
    %84 = arith.mulf %82, %83 : vector<8x64xf32>
    %85 = vector.broadcast %66 : vector<1x64xf32> to vector<8x64xf32>
    %86 = arith.addf %84, %85 : vector<8x64xf32>
    %c0_41 = arith.constant 0 : index
    %c0_42 = arith.constant 0 : index
    %87 = vector.load %arg10[%c0_41, %c0_42] : memref<1x64xbf16, #tpu.memory_space<vmem>>, vector<1x64xbf16>
    %88 = arith.truncf %86 : vector<8x64xf32> to vector<8x64xbf16>
    %cst_43 = arith.constant dense<0.000000e+00> : vector<1x8xf32>
    %89 = tpu.matmul %87, %88, %cst_43 {dimension_numbers = #tpu.dot_dimension_numbers<[1], [1], [0], [0], [0, 0, 1, 0], [], []>} : vector<1x64xbf16>, vector<8x64xbf16>, vector<1x8xf32> -> vector<1x8xf32>
    %c0_44 = arith.constant 0 : index
    %c0_45 = arith.constant 0 : index
    %90 = vector.load %arg11[%c0_44, %c0_45] : memref<1x1xf32, #tpu.memory_space<vmem>>, vector<1x1xf32>
    %91 = vector.broadcast %90 : vector<1x1xf32> to vector<1x8xf32>
    %92 = arith.addf %89, %91 : vector<1x8xf32>
    %c0_46 = arith.constant 0 : index
    %c0_47 = arith.constant 0 : index
    %c0_48 = arith.constant 0 : index
    %93 = vector.load %arg12[%c0_46, %c0_47, %c0_48] : memref<1x1x8xf32, #tpu.memory_space<vmem>>, vector<1x1x8xf32>
    %94 = vector.shape_cast %93 : vector<1x1x8xf32> to vector<1x8xf32>
    %95 = vector.shape_cast %92 : vector<1x8xf32> to vector<1x1x8xf32>
    tpu.vector_store %arg12[%c0_46, %c0_47, %c0_48], %95 {strides = array<i32>} : memref<1x1x8xf32, #tpu.memory_space<vmem>>, vector<1x1x8xf32>,
    return
  }
  func.func @transform_0(%arg0: i32) -> (i32, i32, i32) {
    %c0_i32 = arith.constant 0 : i32
    %c0_i32_0 = arith.constant 0 : i32
    %c0_i32_1 = arith.constant 0 : i32
    return %arg0, %c0_i32, %c0_i32_0 : i32, i32, i32
  }
  func.func @transform_1(%arg0: i32) -> (i32, i32) {
    %c0_i32 = arith.constant 0 : i32
    %c0_i32_0 = arith.constant 0 : i32
    %c0_i32_1 = arith.constant 0 : i32
    return %c0_i32, %c0_i32_0 : i32, i32
  }
  func.func @transform_2(%arg0: i32) -> (i32, i32) {
    %c0_i32 = arith.constant 0 : i32
    %c0_i32_0 = arith.constant 0 : i32
    %c0_i32_1 = arith.constant 0 : i32
    return %c0_i32, %c0_i32_0 : i32, i32
  }
  func.func @transform_3(%arg0: i32) -> (i32, i32) {
    %c0_i32 = arith.constant 0 : i32
    %c0_i32_0 = arith.constant 0 : i32
    %c0_i32_1 = arith.constant 0 : i32
    return %c0_i32, %c0_i32_0 : i32, i32
  }
  func.func @transform_4(%arg0: i32) -> (i32, i32) {
    %c0_i32 = arith.constant 0 : i32
    %c0_i32_0 = arith.constant 0 : i32
    %c0_i32_1 = arith.constant 0 : i32
    return %c0_i32, %c0_i32_0 : i32, i32
  }
  func.func @transform_5(%arg0: i32) -> (i32, i32, i32) {
    %c0_i32 = arith.constant 0 : i32
    %c0_i32_0 = arith.constant 0 : i32
    %c0_i32_1 = arith.constant 0 : i32
    %c0_i32_2 = arith.constant 0 : i32
    return %c0_i32, %c0_i32_0, %c0_i32_1 : i32, i32, i32
  }
  func.func @transform_6(%arg0: i32) -> (i32, i32) {
    %c0_i32 = arith.constant 0 : i32
    %c0_i32_0 = arith.constant 0 : i32
    %c0_i32_1 = arith.constant 0 : i32
    return %c0_i32, %c0_i32_0 : i32, i32
  }
  func.func @transform_7(%arg0: i32) -> (i32, i32) {
    %c0_i32 = arith.constant 0 : i32
    %c0_i32_0 = arith.constant 0 : i32
    %c0_i32_1 = arith.constant 0 : i32
    return %c0_i32, %c0_i32_0 : i32, i32
  }
  func.func @transform_8(%arg0: i32) -> (i32, i32) {
    %c0_i32 = arith.constant 0 : i32
    %c0_i32_0 = arith.constant 0 : i32
    %c0_i32_1 = arith.constant 0 : i32
    return %c0_i32, %c0_i32_0 : i32, i32
  }
  func.func @transform_9(%arg0: i32) -> (i32, i32) {
    %c0_i32 = arith.constant 0 : i32
    %c0_i32_0 = arith.constant 0 : i32
    %c0_i32_1 = arith.constant 0 : i32
    return %c0_i32, %c0_i32_0 : i32, i32
  }
  func.func @transform_10(%arg0: i32) -> (i32, i32) {
    %c0_i32 = arith.constant 0 : i32
    %c0_i32_0 = arith.constant 0 : i32
    %c0_i32_1 = arith.constant 0 : i32
    return %c0_i32, %c0_i32_0 : i32, i32
  }
  func.func @transform_11(%arg0: i32) -> (i32, i32, i32) {
    %c0_i32 = arith.constant 0 : i32
    %c0_i32_0 = arith.constant 0 : i32
    %c0_i32_1 = arith.constant 0 : i32
    return %arg0, %c0_i32, %c0_i32_0 : i32, i32, i32
  }
}

</mosaic_0001>

<bundles_post_ra>
// kernel: tpu_custom_call.1
= control target key start
LH: loop header
LB: loop body
LE: loop exit
PB: predicated region body
PF: predicated region fallthrough
CT: control target
= control target key end

     0   :  { %s1611_s0 = inlined_call_operand.hbm [shape: bf16[2,8,96], index: 0, kind: input, shape index: {}]   ;;  %s1612_s1 = inlined_call_operand.vmem [shape: bf16[96,64], index: 1, kind: input, shape index: {}]   ;;  %s1613_s2 = inlined_call_operand.vmem [shape: f32[1,64], index: 2, kind: input, shape index: {}]   ;;  %s1614_s3 = inlined_call_operand.vmem [shape: f32[1,64], index: 3, kind: input, shape index: {}]   ;;  %s1615_s4 = inlined_call_operand.vmem [shape: f32[1,64], index: 4, kind: input, shape index: {}]   ;;  %s1616_s5 = inlined_call_operand.vmem [shape: bf16[3,64,64], index: 5, kind: input, shape index: {}]   ;;  %s1617_s6 = inlined_call_operand.vmem [shape: f32[1,64], index: 6, kind: input, shape index: {}]   ;;  %s1618_s7 = inlined_call_operand.vmem [shape: f32[1,64], index: 7, kind: input, shape index: {}]   ;;  %s1619_s8 = inlined_call_operand.vmem [shape: f32[1,64], index: 8, kind: input, shape index: {}]   ;;  %s1620_s9 = inlined_call_operand.vmem [shape: bf16[1,64], index: 9, kind: input, shape index: {}]   ;;  %s1621_s10 = inlined_call_operand.<no memory space> [shape: f32[1,1], index: 10, kind: input, shape index: {}]   ;;  %s1622_s11 = inlined_call_operand.hbm [shape: f32[2,1,8], index: 11, kind: output, shape index: {}]  }
   0x1   :  { %v16_v0 = vstv %s1621_s10 }
   0x2   :  { %17 = vst [vmem:[#allocation2] sm:$0x1] %v16_v0 }
   0x3   :  { %18 = vsyncpa [#allocation4], 0 }
   0x4   :  { %20 = vsyncpa [#allocation4 + $0x1], 0 }
   0x5   :  { %21 = vsyncpa [#allocation5], 0 }
   0x6   :  { %23 = vsyncpa [#allocation5 + $0x1], 0  ;;  %s1331_s19 = smov 0   ;;  %s1333_s20 = smov 0  }
   0x7   :  { %s1335_s21 = smov 0   ;;  %s1337_s22 = smov 0  }
   0x8 LB: > { %s1352_s10 = sadd.s32 4294967295, %s1261_s22   ;;  %s956_s23 = sadd.s32 4294967294, %s1261_s22   ;;  %s1261_s22 = sphi %s1337_s22, %s1639_s22   ;;  %s1257_s21 = sphi %s1335_s21, %s1638_s21   ;;  %s1253_s20 = sphi %s1333_s20, %s1637_s20   ;;  %s1249_s19 = sphi %s1331_s19, %s1636_s19  }
   0x9   : > { %s1356_s24 = sadd.s32 1, %s1261_s22   ;;  %s36_s25 = sadd.s32 1, %s1257_s21 }
   0xa   : > { %s33_s26 = ssub.s32 %s1261_s22, %s1356_s24  ;;  %p43_p0 = scmp.ne.s32.totalorder %s1257_s21, %s1253_s20 }
   0xb   : > { %p34_p1 = scmp.eq.s32.totalorder %s33_s26, 0  ;;  %p44_p2 = scmp.eq.s32.totalorder %s1261_s22, 0 }
   0xc   : > { %p49_p3 = scmp.ne.s32.totalorder %s1253_s20, %s1249_s19  ;;  %p50_p4 = scmp.eq.s32.totalorder %s1352_s10, 0 }
   0xd   : > { %s1368_s27 = scalar_select %p34_p1, %s1257_s21, %s36_s25  }
   0xe   : > { %p1370_p5 = por %p44_p2, %p43_p0  ;;  %p1374_p6 = por %p50_p4, %p49_p3 }
   0xf   : > { %1624 = sst [smem:[#allocation9_spill]] %s1368_s27  ;;  %p283_p7 = scmp.eq.s32.totalorder %s1352_s10, 1 }
  0x10   : > { %p289_p8 = scmp.eq.s32.totalorder %s956_s23, 1  ;;  %p1105_p10 = scmp.lt.s32.totalorder %s1261_s22, 2 }
  0x11   : > { %p1381_p11 = por %p283_p7, %p43_p0  ;;  %s339_s13 = sand.u32 1, %s1257_s21  }
  0x12   : > { %p1385_p12 = por %p289_p8, %p49_p3  ;;  %s960_s14 = sshll.u32 %s1261_s22, 6 }
  0x13   : > { %s1627_s30 = scalar_select %p1381_p11, 1, 0 }
  0x14   : > { %s1628_s12 = scalar_select %p1385_p12, 1, 0 }
  0x15   : > { %s959_s15 = sshll.u32 %s339_s13, 2  ;;  %s1394_s18 = scalar_lea.hbm %s1611_s0, %s960_s14 }
  0x16   : > { %s343_s23 = scalar_lea.vmem [#allocation3], %s959_s15  ;;  %p1398_p13 = pnand %p1105_p10, %p1370_p5 }
  0x17   : > { %s350_s25 = sshll.u32 %s343_s23, 4  ;;  %s340_s16 = scalar_lea.sflag [#allocation4], %s339_s13  ;;  %s1402_s25 = int_to_ptr.vmem [resolvable:$true] %s350_s25 }
  0x18   : > { %s1165_s14 = scalar_lea.hbm %s1394_s18, 64  ;;  %p1167_p3 = pneg %p1398_p13 }
  0x19   : > { %p1166_p2 = scmp.ne.s32.totalorder %s1394_s18, %s1165_s14  ;;  %s1170_s17 = scalar_lea.hbm %s1611_s0, 128 }
  0x1a   : > { %p1171_p5 = scmp.lt.u32.totalorder %s1394_s18, %s1611_s0  ;;  %p1172_p8 = scmp.lt.u32.totalorder %s1170_s17, %s1165_s14 }
  0x1b   : > { %p1168_p4 = pnand %p1167_p3, %p1166_p2  ;;  %p1174_p9 = scmp.lt.u32.totalorder %s1165_s14, %s1394_s18 }
  0x1c   : > { %p1173_p10 = por %p1172_p8, %p1171_p5 }
  0x1d   : > { %p1169_p7 = pneg %p1168_p4 }
  0x1e   : > { %p1175_p0 = por %p1174_p9, %p1173_p10 }
  0x20   : > { %p1176_p1 = pnand %p1175_p0, %p1169_p7 }
  0x22   : > { %1179 = shalt.err (!%p1176_p1)
}
  0x23   : > { %s1180_s13 = scalar_lea.vmem %s1402_s25, 64  ;;  %s1263_s28 = smov [#allocation3]  }
  0x24   : > { %p1181_p2 = scmp.ne.s32.totalorder %s1402_s25, %s1180_s13  ;;  %s1185_s15 = sshll.u32 %s1263_s28, 4  ;;  %s1186_s15 = int_to_ptr.vmem [resolvable:$false] %s1185_s15 }
  0x25   : > { %s1187_s27 = scalar_lea.vmem %s1186_s15, 128  ;;  %p1188_p11 = scmp.lt.s32.totalorder %s1402_s25, %s1186_s15 }
  0x26   : > { %p1183_p4 = pnand %p1181_p2, %p1167_p3  ;;  %p1189_p5 = scmp.lt.s32.totalorder %s1187_s27, %s1180_s13 }
  0x28   : > { %p1184_p12 = pneg %p1183_p4  ;;  %p1190_p8 = por %p1189_p5, %p1188_p11 }
  0x2a   : > { %p1191_p9 = pnand %p1190_p8, %p1184_p12 }
  0x2c   : > { %1194 = shalt.err (!%p1191_p9)
}
  0x2d   : > { %1100 = dma.hbm_to_vmem [thread:$0]  (!%p1398_p13), %s1394_s18, 64, %s1402_s25, %s340_s16  }
  0x2e   : > { %p1630_p0 = scmp.lt.s32.totalorder %s1261_s22, 3  ;;  %p1631_p1 = scmp.ge.s32.totalorder %s1261_s22, 1 }
  0x30   : > { %p356_p3 = pnand %p1631_p1, %p1630_p0 }
  0x31   : > { %s1436_s14 = sand.u32 (!%p356_p3), 1, %s1253_s20  }
  0x32   : > { %359 = sbr.rel (%p356_p3) target bundleno = 1402 (0x57a), region = 64  ;;  %s962_s17 = sshll.u32 (!%p356_p3), %s1436_s14, 2 }
  0x33   : > { %s362_s23 = scalar_lea.sflag (!%p356_p3), [#allocation4], %s1436_s14  ;;  %s365_s13 = scalar_lea.vmem (!%p356_p3), [#allocation3], %s962_s17 }
  0x39   : > { %1240 = dma.done.wait (%p1374_p6), %s362_s23, 64  }
  0x3a   : > { %1242 = vsyncadd (%p1374_p6), %s362_s23, 4294967232  ;;  %v1264_v1 = vmov 0.0   ;;  %vm1265_vm0 = vmmov 0   ;;  %v1143_v2 = vld [vmem:[%s1612_s1] sm:$0xff]   ;;  %v1144_v3 = vld [vmem:[%s1612_s1 + $0x8] sm:$0xff]   ;;  %vm460_vm1 = vcmask 785408   ;;  %v536_v33 = vlaneseq }
  0x3b   : > { %1035 = vmatprep.subr.bf16.mxu0 %v1264_v1  ;;  %1047 = vmatprep.mubr.msk.bf16.mxu0 %vm1265_vm0, %v1264_v1  ;;  %v1145_v4 = vld [vmem:[%s1612_s1 + $0x10] sm:$0xff]   ;;  %v1146_v5 = vld [vmem:[%s1612_s1 + $0x18] sm:$0xff]   ;;  %v1147_v6 = vld [vmem:[%s1612_s1 + $0x20] sm:$0xff]   ;;  %vm507_vm2 = vcmask 523264   ;;  %s1008_s15 = sshll.u32 %s1352_s10, 4  ;;  %s402_s27 = scalar_lea.vmem [#allocation6], %s1436_s14 }
  0x3c   : > { %1051 = vmatprep.subr.bf16.mxu1 %v1264_v1  ;;  %1059 = vmatprep.mubr.msk.bf16.mxu1 %vm1265_vm0, %v1264_v1  ;;  %v1148_v7 = vld [vmem:[%s1612_s1 + $0x28] sm:$0xff]   ;;  %v963_v9 = vld [vmem:[%s1613_s2] ss:$0 sm:$0xff]  ;;  %v1152_v25 = vld [vmem:[%s1616_s5 + $0x30] sm:$0xff]   ;;  %v1518_v38 = vshrl.u32 %v536_v33, 7  ;;  %s890_s17 = sshll.u32 %s402_s27, 4  ;;  %s1567_s25 = scalar_lea.hbm %s1622_s11, %s1008_s15  ;;  %s1569_s17 = int_to_ptr.vmem [resolvable:$true] %s890_s17 }
  0x3d   : > { %1036 = vmatpush3.bf16.msra.mxu0 %v1143_v2  ;;  %v404_v8 = vld [vmem:[%s365_s13] sm:$0xf]  ;;  %v1154_v27 = vld [vmem:[%s1616_s5 + $0x38] sm:$0xff]   ;;  %v1155_v28 = vld [vmem:[%s1616_s5 + $0x50] sm:$0xff]   ;;  %vm875_vm5 = vcmask 57344   ;;  %s878_s10 = scalar_lea.sflag [#allocation5], %s1436_s14 }
  0x3e   : > { %1037 = vmatprep.subr.bf16.mxu0 %v1264_v1  ;;  %v1149_v22 = vld [vmem:[%s1616_s5 + $0x20] sm:$0xff]   ;;  %v1150_v23 = vld [vmem:[%s1616_s5 + $0x28] sm:$0xff]   ;;  %v1157_v29 = vld [vmem:[%s1616_s5 + $0x58] sm:$0xff]   ;;  %vm543_vm3 = vcmp.eq.s32.totalorder %v1518_v38, 7  ;;  %vm538_vm4 = vcmp.eq.s32.totalorder %v1518_v38, 0  ;;  %s1195_s26 = scalar_lea.vmem %s1569_s17, 16 }
  0x3f   : > { %1052 = vmatpush3.bf16.msra.mxu1 %v1149_v22  ;;  %v1151_v24 = vld [vmem:[%s1616_s5 + $0x40] sm:$0xff]   ;;  %v1153_v26 = vld [vmem:[%s1616_s5 + $0x48] sm:$0xff]   ;;  %v1159_v47 = vld [vmem:[%s1616_s5 + $0x10] sm:$0xff]   ;;  %p1196_p6 = scmp.ne.s32.totalorder %s1569_s17, %s1195_s26  ;;  %p1632_p11 = scmp.ne.s32.totalorder %s1627_s30, 0 }
  0x40   : > { %1053 = vmatprep.subr.bf16.mxu1 %v1264_v1  ;;  %v971_v35 = vld [vmem:[%s1614_s3] ss:$0 sm:$0xff]  ;;  %v1158_v46 = vld [vmem:[%s1616_s5 + $0x8] sm:$0xff]   ;;  %v1160_v49 = vld [vmem:[%s1616_s5 + $0x18] sm:$0xff]   ;;  %s1267_s29 = smov [#allocation6]  }
  0x41   : > { %1038 = vmatpush3.bf16.msra.mxu0 %v1144_v3  ;;  %v972_v37 = vld [vmem:[%s1615_s4] ss:$0 sm:$0xff]  ;;  %p1197_p12 = pnand %p1196_p6, %p1632_p11  ;;  %s1199_s13 = sshll.u32 %s1267_s29, 4  ;;  %s1200_s13 = int_to_ptr.vmem [resolvable:$false] %s1199_s13 }
  0x42   : > { %1039 = vmatprep.subr.bf16.mxu0 %v1264_v1  ;;  %v1156_v41 = vld [vmem:[%s1616_s5] sm:$0xff]   ;;  %s1201_s16 = scalar_lea.vmem %s1200_s13, 32  ;;  %p1202_p7 = scmp.lt.s32.totalorder %s1569_s17, %s1200_s13 }
  0x43   : > { %1054 = vmatpush3.bf16.msra.mxu1 %v1150_v23  ;;  %v1004_v0 = vld [vmem:[%s1617_s6] ss:$0 sm:$0xff]  ;;  %p1198_p13 = pneg %p1197_p12  ;;  %p1203_p10 = scmp.lt.s32.totalorder %s1201_s16, %s1195_s26 }
  0x44   : > { %1055 = vmatprep.subr.bf16.mxu1 %v1264_v1 }
  0x45   : > { %1040 = vmatpush3.bf16.msra.mxu0 %v1145_v4  ;;  %p1204_p2 = por %p1203_p10, %p1202_p7 }
  0x46   : > { %1041 = vmatprep.subr.bf16.mxu0 %v1264_v1 }
  0x47   : > { %1056 = vmatpush3.bf16.msra.mxu1 %v1152_v25  ;;  %v827_v25 = vsub.s32 0, %v1518_v38  ;;  %p1205_p4 = pnand %p1204_p2, %p1198_p13 }
  0x48   : > { %1057 = vmatprep.subr.bf16.mxu1 %v1264_v1 }
  0x49   : > { %1042 = vmatpush3.bf16.msra.mxu0 %v1146_v5 }
  0x4a   : > { %1043 = vmatprep.subr.bf16.mxu0 %v1264_v1 }
  0x4b   : > { %1058 = vmatpush3.bf16.msra.mxu1 %v1154_v27 }
  0x4c   : > { %1063 = vmatprep.subr.bf16.mxu1 %v1264_v1 }
  0x4d   : > { %1044 = vmatpush3.bf16.msra.mxu0 %v1147_v6 }
  0x4e   : > { %1045 = vmatprep.subr.bf16.mxu0 %v1264_v1 }
  0x51   : > { %1046 = vmatpush3.bf16.msra.mxu0 %v1148_v7 }
  0x52   : > { %1075 = vmatprep.subr.bf16.mxu0 %v1264_v1 }
  0x54   : > { %1048 = vmatmul.mubr.msk.bf16.vlgmr.msra.gmra.mrb[0].mxu0 %vm460_vm1, %v404_v8 }
  0x55   : > { %1083 = vmatprep.mubr.msk.bf16.mxu0 %vm1265_vm0, %v1264_v1  ;;  %1076 = vmatpush3.bf16.msra.mxu0 %v1151_v24  ;;  %v817_v24 = vld [vmem:[%s1620_s9] sm:$0x1] }
  0x56   : > { %1077 = vmatprep.subr.bf16.mxu0 %v1264_v1 }
  0x59   : > { %1078 = vmatpush3.bf16.msra.mxu0 %v1153_v26 }
  0x5a   : > { %1079 = vmatprep.subr.bf16.mxu0 %v1264_v1 }
  0x5d   : > { %1080 = vmatpush3.bf16.msra.mxu0 %v1155_v28 }
  0x5e   : > { %1081 = vmatprep.subr.bf16.mxu0 %v1264_v1 }
  0x61   : > { %1082 = vmatpush3.bf16.msra.mxu0 %v1157_v29 }
 0x127   : > { %v498_v10 = vpop.f32.mrb[0].mxu0 }
 0x128   : > { %v499_v11 = vadd.f32 %v963_v9, %v498_v10  ;;  %v1049_v12 = vpop.f32.mrb[1].mxu0 }
 0x129   : > { %v501_v13 = vpop.f32.mrb[2].mxu0  ;;  %v1266_v12 = vmov 0  }
 0x12a   : > { %v504_v14 = vmax.f32 %v499_v11, 0.0  ;;  %v1050_v15 = vpop.f32.mrb[3].mxu0  ;;  %v819_v11 = vld [vmem:[#allocation2] sm:$0x1]  ;;  %1142 = vset.pattern.permute.xlu0 %v1266_v12 }
 0x12c   : > { %v508_v16 = vsel %vm507_vm2, %v504_v14, 0.0 }
 0x12d   : > { %509 = vadd.xlane.f32.xlu0 %v508_v16 }
 0x1ba   : > { %v510_v17 = vpop.xlane.xlu0 %509 }
 0x1bb   : > { %v512_v18 = vmul.f32 0.015625, %v510_v17  ;;  %v1005_v17 = vld [vmem:[%s1618_s7] ss:$0 sm:$0xff] }
 0x1bd   : > { %v513_v19 = vsub.f32 %v504_v14, %v512_v18 }
 0x1bf   : > { %v514_v20 = vmul.f32 %v513_v19, %v513_v19 }
 0x1c1   : > { %v515_v21 = vsel %vm507_vm2, %v514_v20, 0.0 }
 0x1c2   : > { %516 = vadd.xlane.f32.xlu0 %v515_v21 }
 0x1d8   : > { %822 = vperm.xlu0 %1142, %v819_v11  }
 0x24f   : > { %v517_v30 = vpop.xlane.xlu0 %516 }
 0x250   : > { %v518_v31 = vmul.f32 0.015625, %v517_v30 }
 0x252   : > { %v519_v32 = vadd.f32 1e-05, %v518_v31 }
 0x254   : > { %1161 = vrsqrt.f32 %v519_v32 }
 0x257   : > { %v823_v26 = vpop.permute.xlu0 %822 }
 0x258   : > { %v828_v27 = vrot.slane %v823_v26, %v827_v25 }
 0x25e   : > { %v1162_v34 = vpop.eup %1161 }
 0x25f   : > { %v521_v36 = vmul.f32 %v1162_v34, %v513_v19  ;;  %v1006_v19 = vld [vmem:[%s1619_s8] ss:$0 sm:$0xff] }
 0x261   : > { %v528_v39 = vmul.f32 %v971_v35, %v521_v36 }
 0x263   : > { %v535_v40 = vadd.f32 %v972_v37, %v528_v39 }
 0x265   : > { %v557_v42 = vpack.c.bf16 %v535_v40, %v535_v40  ;;  %v544_v43 = vrot.slane %v535_v40, 1  ;;  %v539_v48 = vrot.slane %v535_v40, 7 }
 0x267   : > { %1060 = vmatmul.mubr.msk.bf16.vlgmr.msra.gmra.mrb[0].mxu1 %vm507_vm2, %v557_v42  ;;  %v547_v44 = vsel %vm543_vm3, 0.0, %v544_v43  ;;  %v542_v50 = vsel %vm538_vm4, 0.0, %v539_v48 }
 0x268   : > { %1064 = vmatpush3.bf16.msra.mxu1 %v1156_v41  ;;  %v701_v45 = vpack.c.bf16 %v547_v44, %v547_v44  ;;  %1071 = vmatprep.mubr.msk.bf16.mxu1 %vm1265_vm0, %v1264_v1  ;;  %v548_v51 = vpack.c.bf16 %v542_v50, %v542_v50 }
 0x269   : > { %1065 = vmatprep.subr.bf16.mxu1 %v1264_v1 }
 0x26a   : > { %1084 = vmatmul.mubr.msk.bf16.vlgmr.msra.gmra.mrb[4].mxu0 %vm507_vm2, %v701_v45 }
 0x26c   : > { %1066 = vmatpush3.bf16.msra.mxu1 %v1158_v46 }
 0x26d   : > { %1067 = vmatprep.subr.bf16.mxu1 %v1264_v1 }
 0x270   : > { %1068 = vmatpush3.bf16.msra.mxu1 %v1159_v47 }
 0x271   : > { %1069 = vmatprep.subr.bf16.mxu1 %v1264_v1 }
 0x274   : > { %1070 = vmatpush3.bf16.msra.mxu1 %v1160_v49 }
 0x275   : > { %1087 = vmatprep.subr.bf16.mxu1 %v1264_v1 }
 0x277   : > { %1072 = vmatmul.mubr.msk.bf16.vlgmr.msra.gmra.mrb[4].mxu1 %vm507_vm2, %v548_v51 }
 0x278   : > { %1089 = vmatprep.mubr.msk.bf16.mxu1 %vm1265_vm0, %v1264_v1 }
 0x33a   : > { %v628_v52 = vpop.f32.mrb[0].mxu1 }
 0x33b   : > { %v1061_v53 = vpop.f32.mrb[1].mxu1 }
 0x33c   : > { %v631_v54 = vpop.f32.mrb[2].mxu1 }
 0x33d   : > { %v1062_v55 = vpop.f32.mrb[3].mxu1  ;;  %v772_v56 = vpop.f32.mrb[4].mxu0 }
 0x33e   : > { %v1085_v57 = vpop.f32.mrb[5].mxu0 }
 0x33f   : > { %v775_v58 = vpop.f32.mrb[6].mxu0 }
 0x340   : > { %v1086_v59 = vpop.f32.mrb[7].mxu0 }
 0x34a   : > { %v695_v60 = vpop.f32.mrb[4].mxu1 }
 0x34b   : > { %v696_v61 = vadd.f32 %v695_v60, %v628_v52  ;;  %v1073_v62 = vpop.f32.mrb[5].mxu1 }
 0x34c   : > { %v698_v63 = vpop.f32.mrb[6].mxu1 }
 0x34d   : > { %v778_v2 = vadd.f32 %v772_v56, %v696_v61  ;;  %v1074_v3 = vpop.f32.mrb[7].mxu1 }
 0x34f   : > { %v786_v4 = vadd.f32 %v1004_v0, %v778_v2 }
 0x351   : > { %v787_v1 = vmax.f32 %v786_v4, 0.0 }
 0x353   : > { %v790_v5 = vsel %vm507_vm2, %v787_v1, 0.0 }
 0x354   : > { %791 = vadd.xlane.f32.xlu1 %v790_v5 }
 0x3e1   : > { %v792_v6 = vpop.xlane.xlu1 %791 }
 0x3e2   : > { %v793_v7 = vmul.f32 0.015625, %v792_v6 }
 0x3e4   : > { %v794_v8 = vsub.f32 %v787_v1, %v793_v7 }
 0x3e6   : > { %v795_v9 = vmul.f32 %v794_v8, %v794_v8 }
 0x3e8   : > { %v796_v10 = vsel %vm507_vm2, %v795_v9, 0.0 }
 0x3e9   : > { %797 = vadd.xlane.f32.xlu1 %v796_v10 }
 0x476   : > { %v798_v13 = vpop.xlane.xlu1 %797 }
 0x477   : > { %v799_v14 = vmul.f32 0.015625, %v798_v13 }
 0x479   : > { %v800_v15 = vadd.f32 1e-05, %v799_v14 }
 0x47b   : > { %1163 = vrsqrt.f32 %v800_v15 }
 0x485   : > { %v1164_v16 = vpop.eup %1163 }
 0x486   : > { %v802_v18 = vmul.f32 %v1164_v16, %v794_v8 }
 0x488   : > { %v809_v20 = vmul.f32 %v1005_v17, %v802_v18 }
 0x48a   : > { %v816_v21 = vadd.f32 %v1006_v19, %v809_v20 }
 0x48c   : > { %v818_v22 = vpack.c.bf16 %v816_v21, %v816_v21 }
 0x48e   : > { %v833_v23 = vsel %vm507_vm2, %v818_v22, 0 }
 0x48f   : > { %1088 = vmatpush3.bf16.xpose.msra.mxu1 %v833_v23 }
 0x496   : > { %1090 = vmatmul.mubr.msk.bf16.vlgmr.msra.gmra.mrb[8].mxu1 %vm507_vm2, %v817_v24 }
 0x569   : > { %v869_v28 = vpop.f32.mrb[8].mxu1 }
 0x56a   : > { %v870_v29 = vadd.f32 %v869_v28, %v828_v27  ;;  %v1091_v30 = vpop.f32.mrb[9].mxu1 }
 0x56b   : > { %v872_v31 = vpop.f32.mrb[10].mxu1 }
 0x56c   : > { %v1092_v32 = vpop.f32.mrb[11].mxu1  ;;  %876 = vst.msk [vmem:[%s402_s27] sm:$0x1] %vm875_vm5, %v870_v29 }
 0x56d   : > { %1208 = shalt.err (!%p1205_p4)
}
 0x56e   : > { %s1209_s14 = scalar_lea.hbm %s1567_s25, 16  ;;  %s1213_s27 = scalar_lea.hbm %s1622_s11, 32 }
 0x56f   : > { %p1210_p5 = scmp.ne.s32.totalorder %s1567_s25, %s1209_s14  ;;  %p1214_p0 = scmp.lt.u32.totalorder %s1567_s25, %s1622_s11 }
 0x570   : > { %p1215_p1 = scmp.lt.u32.totalorder %s1213_s27, %s1209_s14  ;;  %p1217_p6 = scmp.lt.u32.totalorder %s1209_s14, %s1567_s25 }
 0x571   : > { %p1211_p8 = pnand %p1210_p5, %p1632_p11 }
 0x572   : > { %p1216_p3 = por %p1215_p1, %p1214_p0 }
 0x573   : > { %p1212_p9 = pneg %p1211_p8 }
 0x574   : > { %p1218_p12 = por %p1217_p6, %p1216_p3 }
 0x576   : > { %p1219_p13 = pnand %p1218_p12, %p1212_p9 }
 0x578   : > { %1222 = shalt.err (!%p1219_p13)
}
 0x579   : > { %1095 = dma.vmem_to_hbm [thread:$0]  (%p1632_p11), %s1569_s17, 16, %s1567_s25, %s878_s10  }
 0x57a PF: > { %s902_s26 = sand.u32 1, %s1249_s19   ;;  %p1633_p7 = scmp.ne.s32.totalorder %s1628_s12, 0 }
 0x57b   : > { %p1634_p10 = scmp.ge.s32.totalorder %s1261_s22, 2  ;;  %s903_s29 = scalar_lea.sflag [#allocation5], %s902_s26 }
 0x57d   : > { %p1102_p2 = pnand %p1634_p10, %p1633_p7 }
 0x57f   : > { %1244 = dma.done.wait (!%p1102_p2), %s903_s29, 16  }
 0x580   : > { %1246 = vsyncadd (!%p1102_p2), %s903_s29, 4294967280  ;;  %s1635_s13 = sld [smem:[#allocation9_spill]]  ;;  %p26_p4 = scmp.ge.s32.totalorder %s1356_s24, 4  }
 0x581   : > { %s1636_s19 = smov %s1253_s20  ;;  %s1637_s20 = smov %s1257_s21 }
 0x582   : > { %s1639_s22 = smov %s1356_s24  ;;  %28 = sbr.rel (!%p26_p4) target bundleno = 8 (0x8), region = 111 }
 0x586   : > { %s1638_s21 = smov %s1635_s13 }
 0x589   :  { %907 = vsyncpa [#allocation4], 1 }
 0x58a   :  { %909 = vsyncpa [#allocation4 + $0x1], 1 }
 0x58b   :  { %910 = vsyncpa [#allocation5], 1 }
 0x58c   :  { %912 = vsyncpa [#allocation5 + $0x1], 1 }

</bundles_post_ra>
